<compile_context>
chip_gen: v6e
topology: v6e:2x2x1
jax: 0.10.0
libtpu: 0.0.40
codegen_flags: <defaults>
</compile_context>

<pallas_src>
import functools

import jax
import jax.numpy as jnp
from jax.experimental import pallas as pl
from jax.experimental.pallas import tpu as pltpu

NUM_KERNELS = 2                        # len(kernels) in the reference code
IN_FEATURES = 6 + 3 * NUM_KERNELS      # = 12
HIDDEN = (128, 64, 64, 128)
OUT_FEATURES = 3
OUT_PAD = 128                          # lane-dense padded output width


def _round_up(x, m):
    return ((x + m - 1) // m) * m


def _sigmoid_eup(h):
    # sigmoid(h) == 0.5 * (tanh(h/2) + 1): single EUP transcendental + VPU fma.
    return 0.5 * (jnp.tanh(0.5 * h) + 1.0)


def _mlp_kernel(x_ref,
                w1_ref, b1_ref,
                w2_ref, b2_ref,
                w3_ref, b3_ref,
                w4_ref, b4_ref,
                w5_ref, b5_ref,
                o_ref):
    """Fused 5-layer MLP; all weights resident in VMEM, f32 accumulation."""
    h = x_ref[...]  # (tile, 12) f32

    h = _sigmoid_eup(
        jnp.dot(h, w1_ref[...], preferred_element_type=jnp.float32) + b1_ref[...])
    h = _sigmoid_eup(
        jnp.dot(h, w2_ref[...], preferred_element_type=jnp.float32) + b2_ref[...])
    h = _sigmoid_eup(
        jnp.dot(h, w3_ref[...], preferred_element_type=jnp.float32) + b3_ref[...])
    h = _sigmoid_eup(
        jnp.dot(h, w4_ref[...], preferred_element_type=jnp.float32) + b4_ref[...])

    # Final layer: W5/b5 are zero-padded to 128 lanes -> lane-dense store.
    h = jnp.dot(h, w5_ref[...], preferred_element_type=jnp.float32) + b5_ref[...]
    o_ref[...] = h.astype(o_ref.dtype)


@functools.partial(jax.jit, static_argnames=("batch_tile",))
def mlp_forward(x, params, *, batch_tile=512):
    """x: (N, IN_FEATURES) f32; params: list of (W (in,out), b (1,out))."""
    n, f = x.shape
    assert f == IN_FEATURES

    # Choose a batch tile: big enough to amortize per-step overhead, but no
    # bigger than the (8-aligned) batch so tiny inputs don't over-pad.
    tile = min(batch_tile, _round_up(n, 8))
    n_pad = _round_up(n, tile)
    if n_pad != n:
        x = jnp.pad(x, ((0, n_pad - n), (0, 0)))

    # Zero-pad the final layer to 128 output lanes (lane-dense output slab).
    (w1, b1), (w2, b2), (w3, b3), (w4, b4), (w5, b5) = params
    w5p = jnp.zeros((w5.shape[0], OUT_PAD), w5.dtype).at[:, :OUT_FEATURES].set(w5)
    b5p = jnp.zeros((1, OUT_PAD), b5.dtype).at[:, :OUT_FEATURES].set(b5)
    flat = [w1, b1, w2, b2, w3, b3, w4, b4, w5p, b5p]

    x_spec = pl.BlockSpec((tile, f), lambda i: (i, 0))
    param_specs = [pl.BlockSpec(a.shape, lambda i: (0, 0)) for a in flat]
    out_spec = pl.BlockSpec((tile, OUT_PAD), lambda i: (i, 0))

    # Cost hint for XLA scheduling around the custom call.
    flops_per_row = 2 * (IN_FEATURES * 128 + 128 * 64 + 64 * 64 + 64 * 128
                         + 128 * OUT_PAD)
    trans_per_row = sum(HIDDEN)  # one tanh per hidden unit
    weight_bytes = sum(a.size * a.dtype.itemsize for a in flat)
    cost = pl.CostEstimate(
        flops=n_pad * flops_per_row,
        transcendentals=n_pad * trans_per_row,
        bytes_accessed=n_pad * (f + OUT_PAD) * 4 + weight_bytes,
    )

    out = pl.pallas_call(
        _mlp_kernel,
        out_shape=jax.ShapeDtypeStruct((n_pad, OUT_PAD), x.dtype),
        grid_spec=pltpu.PrefetchScalarGridSpec(
            num_scalar_prefetch=0,
            grid=(n_pad // tile,),
            in_specs=[x_spec] + param_specs,
            out_specs=out_spec,
        ),
        compiler_params=pltpu.CompilerParams(
            dimension_semantics=("parallel",)),
        cost_estimate=cost,
    )(x, *flat)

    return out[:n, :OUT_FEATURES]


def init_params(key):
    """Deterministic init mirroring nn.Linear default (uniform +/- 1/sqrt(fan_in))."""
    dims = (IN_FEATURES,) + HIDDEN + (OUT_FEATURES,)
    params = []
    for fan_in, fan_out in zip(dims[:-1], dims[1:]):
        key, kw, kb = jax.random.split(key, 3)
        bound = 1.0 / jnp.sqrt(fan_in)
        w = jax.random.uniform(kw, (fan_in, fan_out), jnp.float32, -bound, bound)
        b = jax.random.uniform(kb, (1, fan_out), jnp.float32, -bound, bound)
        params.append((w, b))
    return params


def mlp_reference(x, params):
    h = x
    for i, (w, b) in enumerate(params):
        h = h @ w + b
        if i < len(params) - 1:
            h = jax.nn.sigmoid(h)
    return h


if __name__ == "__main__":
    key = jax.random.PRNGKey(0)
    kx, kp = jax.random.split(key)

    batch = 8
    x = jax.random.normal(kx, (batch, IN_FEATURES), jnp.float32)
    params = init_params(kp)

    out = mlp_forward(x, params)
    out = jax.block_until_ready(out)

    ref = mlp_reference(x, params)
    assert out.shape == (batch, OUT_FEATURES)
    assert jnp.allclose(out, ref, atol=1e-4, rtol=1e-4)

    # Also exercise a larger, ragged batch (padding + multi-step grid path).
    xb = jax.random.normal(kx, (1000, IN_FEATURES), jnp.float32)
    outb = jax.block_until_ready(mlp_forward(xb, params))
    refb = mlp_reference(xb, params)
    assert outb.shape == (1000, OUT_FEATURES)
    assert jnp.allclose(outb, refb, atol=1e-4, rtol=1e-4)

    print("KERNEL_OK")
</pallas_src>

<mosaic_0001>
module attributes {stable_mosaic.version = 11 : i64} {
  func.func @_mlp_kernel(%arg0: i32, %arg1: memref<8x12xf32, #tpu.memory_space<vmem>>, %arg2: memref<12x128xf32, #tpu.memory_space<vmem>>, %arg3: memref<1x128xf32, #tpu.memory_space<vmem>>, %arg4: memref<128x64xf32, #tpu.memory_space<vmem>>, %arg5: memref<1x64xf32, #tpu.memory_space<vmem>>, %arg6: memref<64x64xf32, #tpu.memory_space<vmem>>, %arg7: memref<1x64xf32, #tpu.memory_space<vmem>>, %arg8: memref<64x128xf32, #tpu.memory_space<vmem>>, %arg9: memref<1x128xf32, #tpu.memory_space<vmem>>, %arg10: memref<128x128xf32, #tpu.memory_space<vmem>>, %arg11: memref<1x128xf32, #tpu.memory_space<vmem>>, %arg12: memref<8x128xf32, #tpu.memory_space<vmem>>) attributes {dimension_semantics = [#tpu.dimension_semantics<parallel>], iteration_bounds = array<i64: 1>, scalar_prefetch = 0 : i64, scratch_operands = 0 : i64, tpu.core_type = #tpu.core_type<tc>, window_params = [{transform_indices = @transform_0, window_bounds = array<i64: 8, 12>}, {pipeline_mode = #tpu.pipeline_mode<synchronous>, transform_indices = @transform_1, window_bounds = array<i64: 12, 128>}, {pipeline_mode = #tpu.pipeline_mode<synchronous>, transform_indices = @transform_2, window_bounds = array<i64: 1, 128>}, {pipeline_mode = #tpu.pipeline_mode<synchronous>, transform_indices = @transform_3, window_bounds = array<i64: 128, 64>}, {pipeline_mode = #tpu.pipeline_mode<synchronous>, transform_indices = @transform_4, window_bounds = array<i64: 1, 64>}, {pipeline_mode = #tpu.pipeline_mode<synchronous>, transform_indices = @transform_5, window_bounds = array<i64: 64, 64>}, {pipeline_mode = #tpu.pipeline_mode<synchronous>, transform_indices = @transform_6, window_bounds = array<i64: 1, 64>}, {pipeline_mode = #tpu.pipeline_mode<synchronous>, transform_indices = @transform_7, window_bounds = array<i64: 64, 128>}, {pipeline_mode = #tpu.pipeline_mode<synchronous>, transform_indices = @transform_8, window_bounds = array<i64: 1, 128>}, {pipeline_mode = #tpu.pipeline_mode<synchronous>, transform_indices = @transform_9, window_bounds = array<i64: 128, 128>}, {pipeline_mode = #tpu.pipeline_mode<synchronous>, transform_indices = @transform_10, window_bounds = array<i64: 1, 128>}, {transform_indices = @transform_11, window_bounds = array<i64: 8, 128>}]} {
    %c0 = arith.constant 0 : index
    %c0_0 = arith.constant 0 : index
    %0 = vector.load %arg1[%c0, %c0_0] : memref<8x12xf32, #tpu.memory_space<vmem>>, vector<8x12xf32>
    %c0_1 = arith.constant 0 : index
    %c0_2 = arith.constant 0 : index
    %1 = vector.load %arg2[%c0_1, %c0_2] : memref<12x128xf32, #tpu.memory_space<vmem>>, vector<12x128xf32>
    %cst = arith.constant dense<0.000000e+00> : vector<8x128xf32>
    %2 = tpu.matmul %0, %1, %cst {dimension_numbers = #tpu.dot_dimension_numbers<[1], [0], [0], [1], [0, 0, 1, 1], [], []>} : vector<8x12xf32>, vector<12x128xf32>, vector<8x128xf32> -> vector<8x128xf32>
    %c0_3 = arith.constant 0 : index
    %c0_4 = arith.constant 0 : index
    %3 = vector.load %arg3[%c0_3, %c0_4] : memref<1x128xf32, #tpu.memory_space<vmem>>, vector<1x128xf32>
    %4 = vector.broadcast %3 : vector<1x128xf32> to vector<8x128xf32>
    %5 = arith.addf %2, %4 : vector<8x128xf32>
    %cst_5 = arith.constant 5.000000e-01 : f32
    %6 = vector.broadcast %cst_5 : f32 to vector<8x128xf32>
    %7 = arith.mulf %6, %5 : vector<8x128xf32>
    %8 = math.tanh %7 : vector<8x128xf32>
    %cst_6 = arith.constant 1.000000e+00 : f32
    %9 = vector.broadcast %cst_6 : f32 to vector<8x128xf32>
    %10 = arith.addf %8, %9 : vector<8x128xf32>
    %cst_7 = arith.constant 5.000000e-01 : f32
    %11 = vector.broadcast %cst_7 : f32 to vector<8x128xf32>
    %12 = arith.mulf %11, %10 : vector<8x128xf32>
    %c0_8 = arith.constant 0 : index
    %c0_9 = arith.constant 0 : index
    %13 = vector.load %arg4[%c0_8, %c0_9] : memref<128x64xf32, #tpu.memory_space<vmem>>, vector<128x64xf32>
    %cst_10 = arith.constant dense<0.000000e+00> : vector<8x64xf32>
    %14 = tpu.matmul %12, %13, %cst_10 {dimension_numbers = #tpu.dot_dimension_numbers<[1], [0], [0], [1], [0, 0, 1, 1], [], []>} : vector<8x128xf32>, vector<128x64xf32>, vector<8x64xf32> -> vector<8x64xf32>
    %c0_11 = arith.constant 0 : index
    %c0_12 = arith.constant 0 : index
    %15 = vector.load %arg5[%c0_11, %c0_12] : memref<1x64xf32, #tpu.memory_space<vmem>>, vector<1x64xf32>
    %16 = vector.broadcast %15 : vector<1x64xf32> to vector<8x64xf32>
    %17 = arith.addf %14, %16 : vector<8x64xf32>
    %cst_13 = arith.constant 5.000000e-01 : f32
    %18 = vector.broadcast %cst_13 : f32 to vector<8x64xf32>
    %19 = arith.mulf %18, %17 : vector<8x64xf32>
    %20 = math.tanh %19 : vector<8x64xf32>
    %cst_14 = arith.constant 1.000000e+00 : f32
    %21 = vector.broadcast %cst_14 : f32 to vector<8x64xf32>
    %22 = arith.addf %20, %21 : vector<8x64xf32>
    %cst_15 = arith.constant 5.000000e-01 : f32
    %23 = vector.broadcast %cst_15 : f32 to vector<8x64xf32>
    %24 = arith.mulf %23, %22 : vector<8x64xf32>
    %c0_16 = arith.constant 0 : index
    %c0_17 = arith.constant 0 : index
    %25 = vector.load %arg6[%c0_16, %c0_17] : memref<64x64xf32, #tpu.memory_space<vmem>>, vector<64x64xf32>
    %cst_18 = arith.constant dense<0.000000e+00> : vector<8x64xf32>
    %26 = tpu.matmul %24, %25, %cst_18 {dimension_numbers = #tpu.dot_dimension_numbers<[1], [0], [0], [1], [0, 0, 1, 1], [], []>} : vector<8x64xf32>, vector<64x64xf32>, vector<8x64xf32> -> vector<8x64xf32>
    %c0_19 = arith.constant 0 : index
    %c0_20 = arith.constant 0 : index
    %27 = vector.load %arg7[%c0_19, %c0_20] : memref<1x64xf32, #tpu.memory_space<vmem>>, vector<1x64xf32>
    %28 = vector.broadcast %27 : vector<1x64xf32> to vector<8x64xf32>
    %29 = arith.addf %26, %28 : vector<8x64xf32>
    %cst_21 = arith.constant 5.000000e-01 : f32
    %30 = vector.broadcast %cst_21 : f32 to vector<8x64xf32>
    %31 = arith.mulf %30, %29 : vector<8x64xf32>
    %32 = math.tanh %31 : vector<8x64xf32>
    %cst_22 = arith.constant 1.000000e+00 : f32
    %33 = vector.broadcast %cst_22 : f32 to vector<8x64xf32>
    %34 = arith.addf %32, %33 : vector<8x64xf32>
    %cst_23 = arith.constant 5.000000e-01 : f32
    %35 = vector.broadcast %cst_23 : f32 to vector<8x64xf32>
    %36 = arith.mulf %35, %34 : vector<8x64xf32>
    %c0_24 = arith.constant 0 : index
    %c0_25 = arith.constant 0 : index
    %37 = vector.load %arg8[%c0_24, %c0_25] : memref<64x128xf32, #tpu.memory_space<vmem>>, vector<64x128xf32>
    %cst_26 = arith.constant dense<0.000000e+00> : vector<8x128xf32>
    %38 = tpu.matmul %36, %37, %cst_26 {dimension_numbers = #tpu.dot_dimension_numbers<[1], [0], [0], [1], [0, 0, 1, 1], [], []>} : vector<8x64xf32>, vector<64x128xf32>, vector<8x128xf32> -> vector<8x128xf32>
    %c0_27 = arith.constant 0 : index
    %c0_28 = arith.constant 0 : index
    %39 = vector.load %arg9[%c0_27, %c0_28] : memref<1x128xf32, #tpu.memory_space<vmem>>, vector<1x128xf32>
    %40 = vector.broadcast %39 : vector<1x128xf32> to vector<8x128xf32>
    %41 = arith.addf %38, %40 : vector<8x128xf32>
    %cst_29 = arith.constant 5.000000e-01 : f32
    %42 = vector.broadcast %cst_29 : f32 to vector<8x128xf32>
    %43 = arith.mulf %42, %41 : vector<8x128xf32>
    %44 = math.tanh %43 : vector<8x128xf32>
    %cst_30 = arith.constant 1.000000e+00 : f32
    %45 = vector.broadcast %cst_30 : f32 to vector<8x128xf32>
    %46 = arith.addf %44, %45 : vector<8x128xf32>
    %cst_31 = arith.constant 5.000000e-01 : f32
    %47 = vector.broadcast %cst_31 : f32 to vector<8x128xf32>
    %48 = arith.mulf %47, %46 : vector<8x128xf32>
    %c0_32 = arith.constant 0 : index
    %c0_33 = arith.constant 0 : index
    %49 = vector.load %arg10[%c0_32, %c0_33] : memref<128x128xf32, #tpu.memory_space<vmem>>, vector<128x128xf32>
    %cst_34 = arith.constant dense<0.000000e+00> : vector<8x128xf32>
    %50 = tpu.matmul %48, %49, %cst_34 {dimension_numbers = #tpu.dot_dimension_numbers<[1], [0], [0], [1], [0, 0, 1, 1], [], []>} : vector<8x128xf32>, vector<128x128xf32>, vector<8x128xf32> -> vector<8x128xf32>
    %c0_35 = arith.constant 0 : index
    %c0_36 = arith.constant 0 : index
    %51 = vector.load %arg11[%c0_35, %c0_36] : memref<1x128xf32, #tpu.memory_space<vmem>>, vector<1x128xf32>
    %52 = vector.broadcast %51 : vector<1x128xf32> to vector<8x128xf32>
    %53 = arith.addf %50, %52 : vector<8x128xf32>
    %c0_37 = arith.constant 0 : index
    %c0_38 = arith.constant 0 : index
    %54 = vector.load %arg12[%c0_37, %c0_38] : memref<8x128xf32, #tpu.memory_space<vmem>>, vector<8x128xf32>
    tpu.vector_store %arg12[%c0_37, %c0_38], %53 {strides = array<i32>} : memref<8x128xf32, #tpu.memory_space<vmem>>, vector<8x128xf32>,
    return
  }
  func.func @transform_0(%arg0: i32) -> (i32, i32) {
    %c0_i32 = arith.constant 0 : i32
    %c0_i32_0 = arith.constant 0 : i32
    return %arg0, %c0_i32 : i32, i32
  }
  func.func @transform_1(%arg0: i32) -> (i32, i32) {
    %c0_i32 = arith.constant 0 : i32
    %c0_i32_0 = arith.constant 0 : i32
    %c0_i32_1 = arith.constant 0 : i32
    return %c0_i32, %c0_i32_0 : i32, i32
  }
  func.func @transform_2(%arg0: i32) -> (i32, i32) {
    %c0_i32 = arith.constant 0 : i32
    %c0_i32_0 = arith.constant 0 : i32
    %c0_i32_1 = arith.constant 0 : i32
    return %c0_i32, %c0_i32_0 : i32, i32
  }
  func.func @transform_3(%arg0: i32) -> (i32, i32) {
    %c0_i32 = arith.constant 0 : i32
    %c0_i32_0 = arith.constant 0 : i32
    %c0_i32_1 = arith.constant 0 : i32
    return %c0_i32, %c0_i32_0 : i32, i32
  }
  func.func @transform_4(%arg0: i32) -> (i32, i32) {
    %c0_i32 = arith.constant 0 : i32
    %c0_i32_0 = arith.constant 0 : i32
    %c0_i32_1 = arith.constant 0 : i32
    return %c0_i32, %c0_i32_0 : i32, i32
  }
  func.func @transform_5(%arg0: i32) -> (i32, i32) {
    %c0_i32 = arith.constant 0 : i32
    %c0_i32_0 = arith.constant 0 : i32
    %c0_i32_1 = arith.constant 0 : i32
    return %c0_i32, %c0_i32_0 : i32, i32
  }
  func.func @transform_6(%arg0: i32) -> (i32, i32) {
    %c0_i32 = arith.constant 0 : i32
    %c0_i32_0 = arith.constant 0 : i32
    %c0_i32_1 = arith.constant 0 : i32
    return %c0_i32, %c0_i32_0 : i32, i32
  }
  func.func @transform_7(%arg0: i32) -> (i32, i32) {
    %c0_i32 = arith.constant 0 : i32
    %c0_i32_0 = arith.constant 0 : i32
    %c0_i32_1 = arith.constant 0 : i32
    return %c0_i32, %c0_i32_0 : i32, i32
  }
  func.func @transform_8(%arg0: i32) -> (i32, i32) {
    %c0_i32 = arith.constant 0 : i32
    %c0_i32_0 = arith.constant 0 : i32
    %c0_i32_1 = arith.constant 0 : i32
    return %c0_i32, %c0_i32_0 : i32, i32
  }
  func.func @transform_9(%arg0: i32) -> (i32, i32) {
    %c0_i32 = arith.constant 0 : i32
    %c0_i32_0 = arith.constant 0 : i32
    %c0_i32_1 = arith.constant 0 : i32
    return %c0_i32, %c0_i32_0 : i32, i32
  }
  func.func @transform_10(%arg0: i32) -> (i32, i32) {
    %c0_i32 = arith.constant 0 : i32
    %c0_i32_0 = arith.constant 0 : i32
    %c0_i32_1 = arith.constant 0 : i32
    return %c0_i32, %c0_i32_0 : i32, i32
  }
  func.func @transform_11(%arg0: i32) -> (i32, i32) {
    %c0_i32 = arith.constant 0 : i32
    %c0_i32_0 = arith.constant 0 : i32
    return %arg0, %c0_i32 : i32, i32
  }
}

</mosaic_0001>

<bundles_post_ra>
// kernel: mlp_forward.1
= control target key start
LH: loop header
LB: loop body
LE: loop exit
PB: predicated region body
PF: predicated region fallthrough
CT: control target
= control target key end

     0   :  { %vm52_vm0 = vcmask 1043456   ;;  %v699_v0 = vmov 0.0   ;;  %vm700_vm1 = vmmov 0   ;;  %vm48_vm2 = vcmask 97280   ;;  %s994_s1 = inlined_call_operand.vmem [shape: f32[12,128], index: 1, kind: input, shape index: {}]   ;;  %s995_s0 = inlined_call_operand.vmem [shape: f32[8,12], index: 0, kind: input, shape index: {}]   ;;  %s996_s3 = inlined_call_operand.vmem [shape: f32[128,64], index: 3, kind: input, shape index: {}]   ;;  %s997_s2 = inlined_call_operand.vmem [shape: f32[1,128], index: 2, kind: input, shape index: {}]   ;;  %s998_s5 = inlined_call_operand.vmem [shape: f32[64,64], index: 5, kind: input, shape index: {}]   ;;  %s999_s4 = inlined_call_operand.vmem [shape: f32[1,64], index: 4, kind: input, shape index: {}]   ;;  %s1000_s7 = inlined_call_operand.vmem [shape: f32[64,128], index: 7, kind: input, shape index: {}]   ;;  %s1001_s9 = inlined_call_operand.vmem [shape: f32[128,128], index: 9, kind: input, shape index: {}]   ;;  %s1002_s6 = inlined_call_operand.vmem [shape: f32[1,64], index: 6, kind: input, shape index: {}]   ;;  %s1003_s8 = inlined_call_operand.vmem [shape: f32[1,128], index: 8, kind: input, shape index: {}]   ;;  %s1004_s10 = inlined_call_operand.vmem [shape: f32[1,128], index: 10, kind: input, shape index: {}]   ;;  %s1005_s11 = inlined_call_operand.vmem [shape: f32[8,128], index: 11, kind: output, shape index: {}]  }
   0x1   :  { %574 = vmatprep.subr.mxu0 %v699_v0  ;;  %v40_v1 = vld [vmem:[%s994_s1 + $0x8] sm:$0xf]  ;;  %v39_v2 = vld [vmem:[%s994_s1] sm:$0xff]  ;;  %578 = vmatprep.mubr.msk.f32.mxu0 %vm700_vm1, %v699_v0  ;;  %v145_v4 = vld [vmem:[%s996_s3 + $0x78] sm:$0xff]  ;;  %vm242_vm3 = vcmask 523264  }
   0x2   :  { %575 = vmatpush3.msk.msra.mxu0 %vm52_vm0, %v40_v1  ;;  %v38_v3 = vld [vmem:[%s995_s0] sm:$0xff]  ;;  %581 = vmatprep.subr.mxu1 %v699_v0  ;;  %v144_v5 = vld [vmem:[%s996_s3 + $0x70] sm:$0xff]  ;;  %v143_v6 = vld [vmem:[%s996_s3 + $0x68] sm:$0xff] }
   0x3   :  { %576 = vmatprep.subr.mxu0 %v699_v0  ;;  %582 = vmatpush3.msra.mxu1 %v145_v4  ;;  %v142_v7 = vld [vmem:[%s996_s3 + $0x60] sm:$0xff]  ;;  %v141_v8 = vld [vmem:[%s996_s3 + $0x58] sm:$0xff]  ;;  %v140_v9 = vld [vmem:[%s996_s3 + $0x50] sm:$0xff] }
   0x4   :  { %577 = vmatpush3.msra.mxu0 %v39_v2  ;;  %583 = vmatprep.subr.mxu1 %v699_v0  ;;  %v139_v10 = vld [vmem:[%s996_s3 + $0x48] sm:$0xff]  ;;  %v138_v11 = vld [vmem:[%s996_s3 + $0x40] sm:$0xff]  ;;  %v137_v12 = vld [vmem:[%s996_s3 + $0x38] sm:$0xff] }
   0x5   :  { %579 = vmatmul.mubr.msk.f32.vlgmr.msra.gmra.mxu0 %vm48_vm2, %v38_v3  ;;  %584 = vmatpush3.msra.mxu1 %v144_v5  ;;  %v136_v13 = vld [vmem:[%s996_s3 + $0x30] sm:$0xff]  ;;  %v135_v14 = vld [vmem:[%s996_s3 + $0x28] sm:$0xff]  ;;  %v134_v15 = vld [vmem:[%s996_s3 + $0x20] sm:$0xff] }
   0x6   :  { %585 = vmatprep.subr.mxu1 %v699_v0  ;;  %613 = vmatprep.mubr.msk.f32.mxu1 %vm700_vm1, %v699_v0  ;;  %v133_v16 = vld [vmem:[%s996_s3 + $0x18] sm:$0xff]  ;;  %v132_v17 = vld [vmem:[%s996_s3 + $0x10] sm:$0xff]  ;;  %v131_v18 = vld [vmem:[%s996_s3 + $0x8] sm:$0xff] }
   0x7   :  { %586 = vmatpush3.msra.mxu1 %v143_v6  ;;  %616 = vmatprep.subr.mxu0 %v699_v0  ;;  %v130_v19 = vld [vmem:[%s996_s3] sm:$0xff]  ;;  %v234_v28 = vld [vmem:[%s998_s5 + $0x38] sm:$0xff]  ;;  %v233_v29 = vld [vmem:[%s998_s5 + $0x30] sm:$0xff] }
   0x8   :  { %587 = vmatprep.subr.mxu1 %v699_v0  ;;  %632 = vmatprep.mubr.msk.f32.mxu0 %vm700_vm1, %v699_v0  ;;  %v510_v20 = vld [vmem:[%s997_s2] ss:$0 sm:$0xff]  ;;  %v232_v30 = vld [vmem:[%s998_s5 + $0x28] sm:$0xff]  ;;  %v230_v32 = vld [vmem:[%s998_s5 + $0x18] sm:$0xff] }
   0x9   :  { %588 = vmatpush3.msra.mxu1 %v142_v7  ;;  %617 = vmatpush3.msra.mxu0 %v234_v28  ;;  %v231_v31 = vld [vmem:[%s998_s5 + $0x20] sm:$0xff]  ;;  %v229_v33 = vld [vmem:[%s998_s5 + $0x10] sm:$0xff]  ;;  %v228_v34 = vld [vmem:[%s998_s5 + $0x8] sm:$0xff] }
   0xa   :  { %589 = vmatprep.subr.mxu1 %v699_v0  ;;  %618 = vmatprep.subr.mxu0 %v699_v0  ;;  %v227_v35 = vld [vmem:[%s998_s5] sm:$0xff]  ;;  %v327_v44 = vld [vmem:[%s1000_s7 + $0x38] sm:$0xff]  ;;  %v326_v45 = vld [vmem:[%s1000_s7 + $0x30] sm:$0xff] }
   0xb   :  { %590 = vmatpush3.msra.mxu1 %v141_v8  ;;  %619 = vmatpush3.msra.mxu0 %v233_v29  ;;  %v513_v36 = vld [vmem:[%s999_s4] ss:$0 sm:$0xff]  ;;  %v325_v46 = vld [vmem:[%s1000_s7 + $0x28] sm:$0xff]  ;;  %v323_v48 = vld [vmem:[%s1000_s7 + $0x18] sm:$0xff] }
   0xc   :  { %591 = vmatprep.subr.mxu1 %v699_v0  ;;  %620 = vmatprep.subr.mxu0 %v699_v0  ;;  %v324_v47 = vld [vmem:[%s1000_s7 + $0x20] sm:$0xff]  ;;  %v322_v49 = vld [vmem:[%s1000_s7 + $0x10] sm:$0xff]  ;;  %v321_v50 = vld [vmem:[%s1000_s7 + $0x8] sm:$0xff] }
   0xd   :  { %592 = vmatpush3.msra.mxu1 %v140_v9  ;;  %621 = vmatpush3.msra.mxu0 %v232_v30  ;;  %v320_v51 = vld [vmem:[%s1000_s7] sm:$0xff]  ;;  %v427_v52 = vld [vmem:[%s1001_s9 + $0x78] sm:$0xff]  ;;  %v426_v53 = vld [vmem:[%s1001_s9 + $0x70] sm:$0xff] }
   0xe   :  { %593 = vmatprep.subr.mxu1 %v699_v0  ;;  %622 = vmatprep.subr.mxu0 %v699_v0  ;;  %v425_v54 = vld [vmem:[%s1001_s9 + $0x68] sm:$0xff]  ;;  %v424_v55 = vld [vmem:[%s1001_s9 + $0x60] sm:$0xff]  ;;  %v423_v1 = vld [vmem:[%s1001_s9 + $0x58] sm:$0xff] }
   0xf   :  { %594 = vmatpush3.msra.mxu1 %v139_v10  ;;  %623 = vmatpush3.msra.mxu0 %v231_v31  ;;  %v514_v56 = vld [vmem:[%s1002_s6] ss:$0 sm:$0xff]  ;;  %v422_v2 = vld [vmem:[%s1001_s9 + $0x50] sm:$0xff]  ;;  %v421_v3 = vld [vmem:[%s1001_s9 + $0x48] sm:$0xff] }
  0x10   :  { %595 = vmatprep.subr.mxu1 %v699_v0  ;;  %624 = vmatprep.subr.mxu0 %v699_v0  ;;  %v420_v4 = vld [vmem:[%s1001_s9 + $0x40] sm:$0xff]  ;;  %v419_v5 = vld [vmem:[%s1001_s9 + $0x38] sm:$0xff]  ;;  %v418_v6 = vld [vmem:[%s1001_s9 + $0x30] sm:$0xff] }
  0x11   :  { %596 = vmatpush3.msra.mxu1 %v138_v11  ;;  %625 = vmatpush3.msra.mxu0 %v230_v32  ;;  %v417_v7 = vld [vmem:[%s1001_s9 + $0x28] sm:$0xff]  ;;  %v416_v8 = vld [vmem:[%s1001_s9 + $0x20] sm:$0xff]  ;;  %v415_v9 = vld [vmem:[%s1001_s9 + $0x18] sm:$0xff] }
  0x12   :  { %597 = vmatprep.subr.mxu1 %v699_v0  ;;  %626 = vmatprep.subr.mxu0 %v699_v0  ;;  %v414_v10 = vld [vmem:[%s1001_s9 + $0x10] sm:$0xff]  ;;  %v413_v11 = vld [vmem:[%s1001_s9 + $0x8] sm:$0xff] }
  0x13   :  { %598 = vmatpush3.msra.mxu1 %v137_v12  ;;  %627 = vmatpush3.msra.mxu0 %v229_v33  ;;  %v412_v12 = vld [vmem:[%s1001_s9] sm:$0xff] }
  0x14   :  { %599 = vmatprep.subr.mxu1 %v699_v0  ;;  %628 = vmatprep.subr.mxu0 %v699_v0 }
  0x15   :  { %600 = vmatpush3.msra.mxu1 %v136_v13  ;;  %629 = vmatpush3.msra.mxu0 %v228_v34  ;;  %v516_v13 = vld [vmem:[%s1003_s8] ss:$0 sm:$0xff] }
  0x16   :  { %601 = vmatprep.subr.mxu1 %v699_v0  ;;  %630 = vmatprep.subr.mxu0 %v699_v0 }
  0x17   :  { %602 = vmatpush3.msra.mxu1 %v135_v14  ;;  %631 = vmatpush3.msra.mxu0 %v227_v35 }
  0x18   :  { %603 = vmatprep.subr.mxu1 %v699_v0  ;;  %635 = vmatprep.subr.mxu0 %v699_v0 }
  0x19   :  { %604 = vmatpush3.msra.mxu1 %v134_v15 }
  0x1a   :  { %605 = vmatprep.subr.mxu1 %v699_v0 }
  0x1b   :  { %606 = vmatpush3.msra.mxu1 %v133_v16 }
  0x1c   :  { %607 = vmatprep.subr.mxu1 %v699_v0 }
  0x1d   :  { %608 = vmatpush3.msra.mxu1 %v132_v17 }
  0x1e   :  { %609 = vmatprep.subr.mxu1 %v699_v0 }
  0x1f   :  { %610 = vmatpush3.msra.mxu1 %v131_v18 }
  0x20   :  { %611 = vmatprep.subr.mxu1 %v699_v0 }
  0x21   :  { %612 = vmatpush3.msra.mxu1 %v130_v19 }
  0x22   :  { %654 = vmatprep.subr.mxu1 %v699_v0 }
  0xc5   :  { %v122_v21 = vpop.f32.mrf.mxu0 }
  0xc6   :  { %v123_v22 = vadd.f32 %v510_v20, %v122_v21 }
  0xc7   :  { %v580_v23 = vpop.f32.mrf.mxu0 }
  0xc8   :  { %v126_v24 = vmul.f32 0.5, %v123_v22 }
  0xca   :  { %691 = vtanh.f32 %v126_v24 }
  0xd7   :  { %v692_v25 = vpop.eup %691 }
  0xd8   :  { %v128_v26 = vadd.f32 1.0, %v692_v25 }
  0xda   :  { %v129_v27 = vmul.f32 0.5, %v128_v26 }
  0xdc   :  { %614 = vmatmul.mubr.f32.vlgmr.msra.gmra.mxu1 %v129_v27 }
  0xdd   :  { %686 = vmatprep.mubr.msk.f32.mxu1 %vm700_vm1, %v699_v0  ;;  %655 = vmatpush3.msra.mxu1 %v427_v52 }
  0xde   :  { %656 = vmatprep.subr.mxu1 %v699_v0 }
  0xdf   :  { %657 = vmatpush3.msra.mxu1 %v426_v53 }
  0xe0   :  { %658 = vmatprep.subr.mxu1 %v699_v0 }
  0xe1   :  { %659 = vmatpush3.msra.mxu1 %v425_v54 }
  0xe2   :  { %660 = vmatprep.subr.mxu1 %v699_v0 }
  0xe3   :  { %661 = vmatpush3.msra.mxu1 %v424_v55 }
  0xe4   :  { %662 = vmatprep.subr.mxu1 %v699_v0 }
  0xe5   :  { %663 = vmatpush3.msra.mxu1 %v423_v1 }
  0xe6   :  { %664 = vmatprep.subr.mxu1 %v699_v0 }
  0xe7   :  { %665 = vmatpush3.msra.mxu1 %v422_v2 }
  0xe8   :  { %666 = vmatprep.subr.mxu1 %v699_v0 }
  0xe9   :  { %667 = vmatpush3.msra.mxu1 %v421_v3 }
  0xea   :  { %668 = vmatprep.subr.mxu1 %v699_v0 }
  0xeb   :  { %669 = vmatpush3.msra.mxu1 %v420_v4 }
  0xec   :  { %670 = vmatprep.subr.mxu1 %v699_v0 }
  0xed   :  { %671 = vmatpush3.msra.mxu1 %v419_v5 }
  0xee   :  { %672 = vmatprep.subr.mxu1 %v699_v0 }
  0xef   :  { %673 = vmatpush3.msra.mxu1 %v418_v6 }
  0xf0   :  { %674 = vmatprep.subr.mxu1 %v699_v0 }
  0xf1   :  { %675 = vmatpush3.msra.mxu1 %v417_v7 }
  0xf2   :  { %676 = vmatprep.subr.mxu1 %v699_v0 }
  0xf3   :  { %677 = vmatpush3.msra.mxu1 %v416_v8 }
  0xf4   :  { %678 = vmatprep.subr.mxu1 %v699_v0 }
  0xf5   :  { %679 = vmatpush3.msra.mxu1 %v415_v9 }
  0xf6   :  { %680 = vmatprep.subr.mxu1 %v699_v0 }
  0xf7   :  { %681 = vmatpush3.msra.mxu1 %v414_v10 }
  0xf8   :  { %682 = vmatprep.subr.mxu1 %v699_v0 }
  0xf9   :  { %683 = vmatpush3.msra.mxu1 %v413_v11 }
  0xfa   :  { %684 = vmatprep.subr.mxu1 %v699_v0 }
  0xfb   :  { %685 = vmatpush3.msra.mxu1 %v412_v12 }
 0x19c   :  { %v219_v37 = vpop.f32.mrf.mxu1 }
 0x19d   :  { %v220_v38 = vadd.f32 %v513_v36, %v219_v37 }
 0x19e   :  { %v615_v39 = vpop.f32.mrf.mxu1 }
 0x19f   :  { %v223_v40 = vmul.f32 0.5, %v220_v38 }
 0x1a1   :  { %693 = vtanh.f32 %v223_v40 }
 0x1ae   :  { %v694_v41 = vpop.eup %693 }
 0x1af   :  { %v225_v42 = vadd.f32 1.0, %v694_v41 }
 0x1b1   :  { %v226_v43 = vmul.f32 0.5, %v225_v42 }
 0x1b3   :  { %633 = vmatmul.mubr.msk.f32.vlgmr.msra.gmra.mxu0 %vm242_vm3, %v226_v43 }
 0x1b4   :  { %651 = vmatprep.mubr.msk.f32.mxu0 %vm700_vm1, %v699_v0  ;;  %636 = vmatpush3.msra.mxu0 %v327_v44 }
 0x1b5   :  { %637 = vmatprep.subr.mxu0 %v699_v0 }
 0x1b6   :  { %638 = vmatpush3.msra.mxu0 %v326_v45 }
 0x1b7   :  { %639 = vmatprep.subr.mxu0 %v699_v0 }
 0x1b8   :  { %640 = vmatpush3.msra.mxu0 %v325_v46 }
 0x1b9   :  { %641 = vmatprep.subr.mxu0 %v699_v0 }
 0x1ba   :  { %642 = vmatpush3.msra.mxu0 %v324_v47 }
 0x1bb   :  { %643 = vmatprep.subr.mxu0 %v699_v0 }
 0x1bc   :  { %644 = vmatpush3.msra.mxu0 %v323_v48 }
 0x1bd   :  { %645 = vmatprep.subr.mxu0 %v699_v0 }
 0x1be   :  { %646 = vmatpush3.msra.mxu0 %v322_v49 }
 0x1bf   :  { %647 = vmatprep.subr.mxu0 %v699_v0 }
 0x1c0   :  { %648 = vmatpush3.msra.mxu0 %v321_v50 }
 0x1c1   :  { %649 = vmatprep.subr.mxu0 %v699_v0  ;;  %v518_v0 = vld [vmem:[%s1004_s10] ss:$0 sm:$0xff] }
 0x1c2   :  { %650 = vmatpush3.msra.mxu0 %v320_v51 }
 0x273   :  { %v312_v57 = vpop.f32.mrf.mxu0 }
 0x274   :  { %v313_v58 = vadd.f32 %v514_v56, %v312_v57 }
 0x275   :  { %v634_v59 = vpop.f32.mrf.mxu0 }
 0x276   :  { %v316_v60 = vmul.f32 0.5, %v313_v58 }
 0x278   :  { %695 = vtanh.f32 %v316_v60 }
 0x285   :  { %v696_v61 = vpop.eup %695 }
 0x286   :  { %v318_v62 = vadd.f32 1.0, %v696_v61 }
 0x288   :  { %v319_v63 = vmul.f32 0.5, %v318_v62 }
 0x28a   :  { %652 = vmatmul.mubr.msk.f32.vlgmr.msra.gmra.mxu0 %vm242_vm3, %v319_v63 }
 0x34a   :  { %v404_v14 = vpop.f32.mrf.mxu0 }
 0x34b   :  { %v405_v15 = vadd.f32 %v516_v13, %v404_v14 }
 0x34c   :  { %v653_v16 = vpop.f32.mrf.mxu0 }
 0x34d   :  { %v408_v17 = vmul.f32 0.5, %v405_v15 }
 0x34f   :  { %697 = vtanh.f32 %v408_v17 }
 0x35c   :  { %v698_v18 = vpop.eup %697 }
 0x35d   :  { %v410_v19 = vadd.f32 1.0, %v698_v18 }
 0x35f   :  { %v411_v20 = vmul.f32 0.5, %v410_v19 }
 0x361   :  { %687 = vmatmul.mubr.f32.vlgmr.msra.gmra.mxu1 %v411_v20 }
 0x421   :  { %v501_v21 = vpop.f32.mrf.mxu1 }
 0x422   :  { %v502_v22 = vadd.f32 %v518_v0, %v501_v21 }
 0x423   :  { %v688_v23 = vpop.f32.mrf.mxu1 }
 0x424   :  { %505 = vst [vmem:[%s1005_s11] sm:$0xff] %v502_v22 }

</bundles_post_ra>
